<compile_context>
chip_gen: v5e
topology: v5e:2x2
jax: 0.10.0
libtpu: 0.0.40
codegen_flags: <defaults>
</compile_context>

<pallas_src>
import jax
import jax.numpy as jnp
from jax import lax
from jax.experimental import pallas as pl
from jax.experimental.pallas import tpu as pltpu


_SUB = 128  # rows processed per inner compute step (one lane-row of output)


def _lr_kernel_dense(x_ref, w_ref, b_ref, o_ref):
    """Grid-step body with a lane-dense epilogue.

    x_ref: (TB, F) VMEM   w_ref: (1, F) VMEM (resident)   b_ref: (1, 1) SMEM
    o_ref: (TB // 128, 128) VMEM -- element (g, l) is the result for tile row g*128 + l.
    """
    w = w_ref[...].astype(jnp.float32)          # (1, F)
    b = b_ref[0, 0]
    nsub = o_ref.shape[0]                       # TB // 128 (static)

    def body(j, carry):
        r0 = pl.multiple_of(j * _SUB, _SUB)
        xs = x_ref[pl.ds(r0, _SUB), :].astype(jnp.float32)     # (128, F), cast in-kernel
        prod = xs * w                                          # exact f32 on the VPU
        # Transpose the small weighted chunk so per-row sums land in lanes (XLU has
        # slack); the epilogue then runs fully packed instead of 1 of 128 lanes.
        z = jnp.sum(prod.T, axis=0, keepdims=True) + b         # (1, 128) lane-dense
        o_ref[pl.ds(j, 1), :] = 1.0 / (1.0 + jnp.exp(-z))      # exact sigmoid, full vst
        return carry

    lax.fori_loop(0, nsub, body, 0, unroll=min(8, nsub))


def _lr_kernel_cols(x_ref, w_ref, b_ref, o_ref):
    """Fallback body with the (TB, 1) output layout (masked stores).  Only used if the
    dense kernel's transpose-based lowering is rejected by the Mosaic version in use."""
    w = w_ref[...].astype(jnp.float32)
    b = b_ref[0, 0]
    nsub = x_ref.shape[0] // _SUB

    def body(j, carry):
        r0 = pl.multiple_of(j * _SUB, _SUB)
        xs = x_ref[pl.ds(r0, _SUB), :].astype(jnp.float32)
        z = jnp.sum(xs * w, axis=-1, keepdims=True) + b        # (128, 1)
        o_ref[pl.ds(r0, _SUB), :] = 1.0 / (1.0 + jnp.exp(-z))
        return carry

    lax.fori_loop(0, nsub, body, 0, unroll=min(8, nsub))


def _tile_rows(batch, feat, itemsize):
    """Rows of x per grid step.

    ~8 MiB of x per DMA (double-buffered ~16 MiB: fits the 32 MiB scoped-VMEM default on
    v5e/v6e and v7x's 64 MiB with headroom).  Always a multiple of 128; a multiple of 1024
    whenever the grid has more than one step so the (TB//128, 128) output block keeps
    (8, 128)-aligned tiling.  Capped at ~batch//2 when possible so v7x's two TensorCores
    both get grid steps.
    """
    if batch <= 1024:
        return max(_SUB, ((batch + _SUB - 1) // _SUB) * _SUB)
    tb = (8 * 1024 * 1024) // max(feat * itemsize, 1)
    tb = max(1024, (tb // 1024) * 1024)
    tb = min(tb, (batch // 1024) * 1024)                       # block never wider than x
    tb = min(tb, max(1024, ((batch // 2) // 1024) * 1024))     # >= 2 steps for v7x
    return tb


def lr_forward(x, w, b):
    """sigmoid(x @ w.T + b).  x: (B, F); w: nn.Linear weight (1, F) (or (F,) / (F, 1));
    b: scalar bias.  Returns (B, 1) float32."""
    B, F = x.shape
    w_row = jnp.reshape(w, (1, F)).astype(jnp.float32)   # tiny, resident in VMEM
    b2d = jnp.reshape(b, (1, 1)).astype(jnp.float32)     # scalar bias in SMEM
    # NOTE: x is NOT cast or copied in the wrapper -- it is streamed as-is and cast (if
    # needed) inside the kernel, so the only HBM pass over x is the kernel's own DMA.

    tb = _tile_rows(B, F, x.dtype.itemsize)
    x_in = x
    rows = B
    if rows < tb:
        # Tiny batches only (< one tile): pad by at most 127 rows so one aligned block
        # covers the batch.  Large batches are never padded; the ragged last block is a
        # Pallas partial block and the extra rows are sliced off below.
        x_in = jnp.pad(x, ((0, tb - rows), (0, 0)))
        rows = tb
    num_tiles = pl.cdiv(rows, tb)

    in_specs = [
        pl.BlockSpec((tb, F), lambda i: (i, 0)),                 # batch-tiled x
        pl.BlockSpec((1, F), lambda i: (0, 0)),                  # resident weight row
        pl.BlockSpec(memory_space=pltpu.MemorySpace.SMEM),       # scalar bias
    ]
    common = dict(
        grid=(num_tiles,),
        in_specs=in_specs,
        compiler_params=pltpu.CompilerParams(dimension_semantics=("parallel",)),
        cost_estimate=pl.CostEstimate(
            flops=2 * B * F,
            transcendentals=B,
            bytes_accessed=B * F * x.dtype.itemsize + F * 4 + B * 4,
        ),
    )

    try:
        out = pl.pallas_call(
            _lr_kernel_dense,
            out_shape=jax.ShapeDtypeStruct((num_tiles * (tb // _SUB), _SUB), jnp.float32),
            out_specs=pl.BlockSpec((tb // _SUB, _SUB), lambda i: (i, 0)),
            **common,
        )(x_in, w_row, b2d)
    except Exception:  # lowering guard: fall back to the sparse-output layout
        out = pl.pallas_call(
            _lr_kernel_cols,
            out_shape=jax.ShapeDtypeStruct((num_tiles * tb, 1), jnp.float32),
            out_specs=pl.BlockSpec((tb, 1), lambda i: (i, 0)),
            **common,
        )(x_in, w_row, b2d)

    # TODO(synk): for very large in_features, split F over a second ("arbitrary") grid
    # axis with a VMEM accumulator instead of a single (tb, F) block.
    return out.reshape(-1)[:B].reshape(B, 1)


if __name__ == "__main__":
    key = jax.random.PRNGKey(0)
    kw, kb, kx1, kx2, kx3 = jax.random.split(key, 5)

    in_features = 32
    bound = float(in_features) ** -0.5  # mimic nn.Linear's U(-1/sqrt(F), 1/sqrt(F)) init
    weight = jax.random.uniform(kw, (1, in_features), jnp.float32, -bound, bound)
    bias = jax.random.uniform(kb, (), jnp.float32, -bound, bound)

    def reference(xx):
        # Exact-f32 reference (no MXU precision ambiguity).
        z = jnp.sum(xx * weight, axis=-1, keepdims=True) + bias
        return 1.0 / (1.0 + jnp.exp(-z))

    cases = [
        ("tiny batch", 8, kx1),             # single 128-row tile (padded)
        ("ragged small batch", 300, kx2),   # single 384-row tile (padded)
        ("multi-tile batch", 2600, kx3),    # 3 grid steps, ragged last block, no padding
    ]
    for name, batch, kx in cases:
        x = jax.random.normal(kx, (batch, in_features), jnp.float32)
        out = jax.block_until_ready(lr_forward(x, weight, bias))
        ref = reference(x)
        assert out.shape == (batch, 1), f"bad output shape for {name}: {out.shape}"
        assert jnp.allclose(out, ref, atol=1e-5, rtol=1e-5), f"mismatch vs reference ({name})"

    print("KERNEL_OK")
</pallas_src>

<mosaic_0001>
module attributes {stable_mosaic.version = 11 : i64} {
  func.func @_lr_kernel_dense(%arg0: i32, %arg1: memref<128x32xf32, #tpu.memory_space<vmem>>, %arg2: memref<1x32xf32, #tpu.memory_space<vmem>>, %arg3: memref<1x1xf32, #tpu.memory_space<smem>>, %arg4: memref<1x128xf32, #tpu.memory_space<vmem>>) attributes {dimension_semantics = [#tpu.dimension_semantics<parallel>], iteration_bounds = array<i64: 1>, scalar_prefetch = 0 : i64, scratch_operands = 0 : i64, tpu.core_type = #tpu.core_type<tc>, window_params = [{transform_indices = @transform_0, window_bounds = array<i64: 128, 32>}, {pipeline_mode = #tpu.pipeline_mode<synchronous>, transform_indices = @transform_1, window_bounds = array<i64: 1, 32>}, {transform_indices = @transform_2, window_bounds = array<i64: 1, 1>}, {transform_indices = @transform_3, window_bounds = array<i64: 1, 128>}]} {
    %c0 = arith.constant 0 : index
    %c0_0 = arith.constant 0 : index
    %0 = vector.load %arg2[%c0, %c0_0] : memref<1x32xf32, #tpu.memory_space<vmem>>, vector<1x32xf32>
    %c0_1 = arith.constant 0 : index
    %c0_2 = arith.constant 0 : index
    %1 = memref.load %arg3[%c0_1, %c0_2] : memref<1x1xf32, #tpu.memory_space<smem>>
    %c0_i32 = arith.constant 0 : i32
    %c128_i32 = arith.constant 128 : i32
    %2 = arith.muli %c0_i32, %c128_i32 : i32
    %3 = tpu.assume_multiple %2, 128 : i32
    %4 = arith.index_cast %3 : i32 to index
    %c0_3 = arith.constant 0 : index
    %5 = vector.load %arg1[%4, %c0_3] : memref<128x32xf32, #tpu.memory_space<vmem>>, vector<128x32xf32>
    %6 = vector.broadcast %0 : vector<1x32xf32> to vector<128x32xf32>
    %7 = arith.mulf %5, %6 : vector<128x32xf32>
    %8 = tpu.transpose %7, [1, 0] : vector<128x32xf32> -> vector<32x128xf32>
    %cst = arith.constant dense<0.000000e+00> : vector<128xf32>
    %9 = vector.multi_reduction <add>, %8, %cst [0] : vector<32x128xf32> to vector<128xf32>
    %10 = vector.shape_cast %9 : vector<128xf32> to vector<1x128xf32>
    %11 = vector.broadcast %1 : f32 to vector<1x128xf32>
    %12 = arith.addf %10, %11 : vector<1x128xf32>
    %cst_4 = arith.constant 0.000000e+00 : f32
    %13 = vector.broadcast %cst_4 : f32 to vector<1x128xf32>
    %14 = arith.subf %13, %12 : vector<1x128xf32>
    %15 = math.exp %14 : vector<1x128xf32>
    %cst_5 = arith.constant 1.000000e+00 : f32
    %16 = vector.broadcast %cst_5 : f32 to vector<1x128xf32>
    %17 = arith.addf %16, %15 : vector<1x128xf32>
    %cst_6 = arith.constant 1.000000e+00 : f32
    %18 = vector.broadcast %cst_6 : f32 to vector<1x128xf32>
    %19 = arith.divf %18, %17 : vector<1x128xf32>
    %20 = arith.index_cast %c0_i32 : i32 to index
    %c0_7 = arith.constant 0 : index
    %21 = vector.load %arg4[%20, %c0_7] : memref<1x128xf32, #tpu.memory_space<vmem>>, vector<1x128xf32>
    tpu.vector_store %arg4[%20, %c0_7], %19 {strides = array<i32>} : memref<1x128xf32, #tpu.memory_space<vmem>>, vector<1x128xf32>,
    %c1_i32 = arith.constant 1 : i32
    return
  }
  func.func @transform_0(%arg0: i32) -> (i32, i32) {
    %c0_i32 = arith.constant 0 : i32
    %c0_i32_0 = arith.constant 0 : i32
    return %arg0, %c0_i32 : i32, i32
  }
  func.func @transform_1(%arg0: i32) -> (i32, i32) {
    %c0_i32 = arith.constant 0 : i32
    %c0_i32_0 = arith.constant 0 : i32
    %c0_i32_1 = arith.constant 0 : i32
    return %c0_i32, %c0_i32_0 : i32, i32
  }
  func.func @transform_2(%arg0: i32) -> (i32, i32) {
    %c0_i32 = arith.constant 0 : i32
    %c0_i32_0 = arith.constant 0 : i32
    %c0_i32_1 = arith.constant 0 : i32
    return %c0_i32, %c0_i32_0 : i32, i32
  }
  func.func @transform_3(%arg0: i32) -> (i32, i32) {
    %c0_i32 = arith.constant 0 : i32
    %c0_i32_0 = arith.constant 0 : i32
    return %arg0, %c0_i32 : i32, i32
  }
}

module attributes {stable_mosaic.version = 11 : i64} {
  func.func @_lr_kernel_cols(%arg0: i32, %arg1: memref<128x32xf32, #tpu.memory_space<vmem>>, %arg2: memref<1x32xf32, #tpu.memory_space<vmem>>, %arg3: memref<1x1xf32, #tpu.memory_space<smem>>, %arg4: memref<128x1xf32, #tpu.memory_space<vmem>>) attributes {dimension_semantics = [#tpu.dimension_semantics<parallel>], iteration_bounds = array<i64: 1>, scalar_prefetch = 0 : i64, scratch_operands = 0 : i64, tpu.core_type = #tpu.core_type<tc>, window_params = [{transform_indices = @transform_0, window_bounds = array<i64: 128, 32>}, {pipeline_mode = #tpu.pipeline_mode<synchronous>, transform_indices = @transform_1, window_bounds = array<i64: 1, 32>}, {transform_indices = @transform_2, window_bounds = array<i64: 1, 1>}, {transform_indices = @transform_3, window_bounds = array<i64: 128, 1>}]} {
    %c0 = arith.constant 0 : index
    %c0_0 = arith.constant 0 : index
    %0 = vector.load %arg2[%c0, %c0_0] : memref<1x32xf32, #tpu.memory_space<vmem>>, vector<1x32xf32>
    %c0_1 = arith.constant 0 : index
    %c0_2 = arith.constant 0 : index
    %1 = memref.load %arg3[%c0_1, %c0_2] : memref<1x1xf32, #tpu.memory_space<smem>>
    %c0_i32 = arith.constant 0 : i32
    %c128_i32 = arith.constant 128 : i32
    %2 = arith.muli %c0_i32, %c128_i32 : i32
    %3 = tpu.assume_multiple %2, 128 : i32
    %4 = arith.index_cast %3 : i32 to index
    %c0_3 = arith.constant 0 : index
    %5 = vector.load %arg1[%4, %c0_3] : memref<128x32xf32, #tpu.memory_space<vmem>>, vector<128x32xf32>
    %6 = vector.broadcast %0 : vector<1x32xf32> to vector<128x32xf32>
    %7 = arith.mulf %5, %6 : vector<128x32xf32>
    %cst = arith.constant dense<0.000000e+00> : vector<128xf32>
    %8 = vector.multi_reduction <add>, %7, %cst [1] : vector<128x32xf32> to vector<128xf32>
    %9 = vector.shape_cast %8 : vector<128xf32> to vector<128x1xf32>
    %10 = vector.broadcast %1 : f32 to vector<128x1xf32>
    %11 = arith.addf %9, %10 : vector<128x1xf32>
    %cst_4 = arith.constant 0.000000e+00 : f32
    %12 = vector.broadcast %cst_4 : f32 to vector<128x1xf32>
    %13 = arith.subf %12, %11 : vector<128x1xf32>
    %14 = math.exp %13 : vector<128x1xf32>
    %cst_5 = arith.constant 1.000000e+00 : f32
    %15 = vector.broadcast %cst_5 : f32 to vector<128x1xf32>
    %16 = arith.addf %15, %14 : vector<128x1xf32>
    %cst_6 = arith.constant 1.000000e+00 : f32
    %17 = vector.broadcast %cst_6 : f32 to vector<128x1xf32>
    %18 = arith.divf %17, %16 : vector<128x1xf32>
    %19 = arith.index_cast %3 : i32 to index
    %c0_7 = arith.constant 0 : index
    %20 = vector.load %arg4[%19, %c0_7] : memref<128x1xf32, #tpu.memory_space<vmem>>, vector<128x1xf32>
    tpu.vector_store %arg4[%19, %c0_7], %18 {strides = array<i32>} : memref<128x1xf32, #tpu.memory_space<vmem>>, vector<128x1xf32>,
    %c1_i32 = arith.constant 1 : i32
    return
  }
  func.func @transform_0(%arg0: i32) -> (i32, i32) {
    %c0_i32 = arith.constant 0 : i32
    %c0_i32_0 = arith.constant 0 : i32
    return %arg0, %c0_i32 : i32, i32
  }
  func.func @transform_1(%arg0: i32) -> (i32, i32) {
    %c0_i32 = arith.constant 0 : i32
    %c0_i32_0 = arith.constant 0 : i32
    %c0_i32_1 = arith.constant 0 : i32
    return %c0_i32, %c0_i32_0 : i32, i32
  }
  func.func @transform_2(%arg0: i32) -> (i32, i32) {
    %c0_i32 = arith.constant 0 : i32
    %c0_i32_0 = arith.constant 0 : i32
    %c0_i32_1 = arith.constant 0 : i32
    return %c0_i32, %c0_i32_0 : i32, i32
  }
  func.func @transform_3(%arg0: i32) -> (i32, i32) {
    %c0_i32 = arith.constant 0 : i32
    %c0_i32_0 = arith.constant 0 : i32
    return %arg0, %c0_i32 : i32, i32
  }
}

</mosaic_0001>

<bundles_post_ra>
// kernel: tpu_custom_call.1
= control target key start
LH: loop header
LB: loop body
LE: loop exit
PB: predicated region body
PF: predicated region fallthrough
CT: control target
= control target key end

     0   :  { %s242_s0 = inlined_call_operand.vmem [shape: f32[128,32], index: 0, kind: input, shape index: {}]   ;;  %s243_s1 = inlined_call_operand.vmem [shape: f32[1,32], index: 1, kind: input, shape index: {}]   ;;  %s244_s2 = inlined_call_operand.<no memory space> [shape: f32[1,1], index: 2, kind: input, shape index: {}]   ;;  %s245_s3 = inlined_call_operand.hbm [shape: f32[1,128], index: 3, kind: output, shape index: {}]  }
   0x1   :  { %v18_v0 = vld [vmem:[%s242_s0] sm:$0xff] }
   0x2   :  { %v133_v1 = vld [vmem:[%s243_s1] ss:$0 sm:$0xff] }
   0x3   :  { %v37_v2 = vmul.f32 %v133_v1, %v18_v0 }
   0x4   :  { %9 = vsyncpa [#allocation4], 0  ;;  %v19_v3 = vld [vmem:[%s242_s0 + $0x8] sm:$0xff]  ;;  %v20_v5 = vld [vmem:[%s242_s0 + $0x10] sm:$0xff]  ;;  %v94_v45 = vstv %s244_s2  ;;  %s123_s2 = sshll.u32 %s245_s3, 4  ;;  %s124_s2 = int_to_ptr.hbm [resolvable:$true] %s123_s2 }
   0x5   :  { %53 = vxpose.xlu0.b32.start [1/16] (narrow) %v37_v2, 32  ;;  %v38_v4 = vmul.f32 %v133_v1, %v19_v3  ;;  %v39_v6 = vmul.f32 %v133_v1, %v20_v5  ;;  %v21_v7 = vld [vmem:[%s242_s0 + $0x18] sm:$0xff]  ;;  %v22_v9 = vld [vmem:[%s242_s0 + $0x20] sm:$0xff]  ;;  %v23_v11 = vld [vmem:[%s242_s0 + $0x28] sm:$0xff] }
   0x6   :  { %v40_v8 = vmul.f32 %v133_v1, %v21_v7  ;;  %v41_v10 = vmul.f32 %v133_v1, %v22_v9  ;;  %v42_v12 = vmul.f32 %v133_v1, %v23_v11  ;;  %v24_v13 = vld [vmem:[%s242_s0 + $0x30] sm:$0xff]  ;;  %v25_v15 = vld [vmem:[%s242_s0 + $0x38] sm:$0xff]  ;;  %v26_v17 = vld [vmem:[%s242_s0 + $0x40] sm:$0xff] }
   0x7   :  { %v43_v14 = vmul.f32 %v133_v1, %v24_v13  ;;  %v44_v16 = vmul.f32 %v133_v1, %v25_v15  ;;  %v45_v18 = vmul.f32 %v133_v1, %v26_v17  ;;  %v27_v19 = vld [vmem:[%s242_s0 + $0x48] sm:$0xff]  ;;  %v28_v21 = vld [vmem:[%s242_s0 + $0x50] sm:$0xff]  ;;  %v29_v23 = vld [vmem:[%s242_s0 + $0x58] sm:$0xff] }
   0x8   :  { %v46_v20 = vmul.f32 %v133_v1, %v27_v19  ;;  %v47_v22 = vmul.f32 %v133_v1, %v28_v21  ;;  %v48_v24 = vmul.f32 %v133_v1, %v29_v23  ;;  %v30_v25 = vld [vmem:[%s242_s0 + $0x60] sm:$0xff]  ;;  %v31_v27 = vld [vmem:[%s242_s0 + $0x68] sm:$0xff]  ;;  %v32_v29 = vld [vmem:[%s242_s0 + $0x70] sm:$0xff] }
   0x9   :  { %v49_v26 = vmul.f32 %v133_v1, %v30_v25  ;;  %v50_v28 = vmul.f32 %v133_v1, %v31_v27  ;;  %v51_v30 = vmul.f32 %v133_v1, %v32_v29  ;;  %v33_v31 = vld [vmem:[%s242_s0 + $0x78] sm:$0xff]  ;;  %s164_s0 = smov [#allocation3]  }
   0xa   :  { %v52_v32 = vmul.f32 %v133_v1, %v33_v31  ;;  %s121_s20 = sshll.u32 %s164_s0, 4  ;;  %s122_s20 = int_to_ptr.vmem [resolvable:$true] %s121_s20 }
   0xd   :  { %54 = vxpose.xlu0.b32.cont [2/16] (narrow) %v38_v4, 32 }
  0x15   :  { %55 = vxpose.xlu0.b32.cont [3/16] (narrow) %v39_v6, 32 }
  0x1d   :  { %56 = vxpose.xlu0.b32.cont [4/16] (narrow) %v40_v8, 32 }
  0x25   :  { %57 = vxpose.xlu0.b32.cont [5/16] (narrow) %v41_v10, 32 }
  0x2d   :  { %58 = vxpose.xlu0.b32.cont [6/16] (narrow) %v42_v12, 32 }
  0x35   :  { %59 = vxpose.xlu0.b32.cont [7/16] (narrow) %v43_v14, 32 }
  0x3d   :  { %60 = vxpose.xlu0.b32.cont [8/16] (narrow) %v44_v16, 32 }
  0x45   :  { %61 = vxpose.xlu0.b32.cont [9/16] (narrow) %v45_v18, 32 }
  0x4d   :  { %62 = vxpose.xlu0.b32.cont [10/16] (narrow) %v46_v20, 32 }
  0x55   :  { %63 = vxpose.xlu0.b32.cont [11/16] (narrow) %v47_v22, 32 }
  0x5d   :  { %64 = vxpose.xlu0.b32.cont [12/16] (narrow) %v48_v24, 32 }
  0x65   :  { %65 = vxpose.xlu0.b32.cont [13/16] (narrow) %v49_v26, 32 }
  0x6d   :  { %66 = vxpose.xlu0.b32.cont [14/16] (narrow) %v50_v28, 32 }
  0x75   :  { %67 = vxpose.xlu0.b32.cont [15/16] (narrow) %v51_v30, 32 }
  0x7d   :  { %68 = vxpose.xlu0.b32.end [16/16] (narrow) %v52_v32, 32 }
  0xa9   :  { %v69_v33 = vpop.trf.xlu0 }
  0xb1   :  { %v70_v34 = vpop.trf.xlu0 }
  0xb2   :  { %v85_v36 = vadd.f32 %v70_v34, %v69_v33 }
  0xb9   :  { %v71_v35 = vpop.trf.xlu0 }
  0xba   :  { %v86_v37 = vadd.f32 %v85_v36, %v71_v35 }
  0xc1   :  { %v72_v38 = vpop.trf.xlu0 }
  0xc2   :  { %v87_v39 = vadd.f32 %v86_v37, %v72_v38 }
  0xc4   :  { %v88_v40 = vrot.slane %v87_v39, 4 }
  0xc6   :  { %v89_v41 = vadd.f32 %v88_v40, %v87_v39 }
  0xc8   :  { %v90_v42 = vrot.slane %v89_v41, 2 }
  0xca   :  { %v91_v43 = vadd.f32 %v90_v42, %v89_v41 }
  0xcc   :  { %v92_v44 = vrot.slane %v91_v43, 1 }
  0xce   :  { %v93_v46 = vadd.f32 %v92_v44, %v91_v43 }
  0xd0   :  { %v95_v47 = vadd.f32 %v94_v45, %v93_v46 }
  0xd2   :  { %v96_v48 = vsub.f32 0.0, %v95_v47 }
  0xd4   :  { %v97_v49 = vmul.f32 1.442695, %v96_v48 }
  0xd6   :  { %134 = vpow2.f32 %v97_v49 }
  0xdc   :  { %v135_v50 = vpop.eup %134 }
  0xdd   :  { %v99_v51 = vadd.f32 1.0, %v135_v50 }
  0xdf   :  { %136 = vrcp.f32 %v99_v51  ;;  %v111_v55 = vand.u32 2147483648, %v99_v51  ;;  %v109_v57 = vand.u32 2147483647, %v99_v51  ;;  %vm105_vm1 = vweird.f32 %v99_v51 }
  0xe1   :  { %v112_v59 = vor.u32 1.1754944e-38, %v111_v55  ;;  %vm110_vm3 = vcmp.eq.f32.partialorder %v109_v57, 8.507059e+37 }
  0xe5   :  { %v137_v52 = vpop.eup %136 }
  0xe6   :  { %v101_v53 = vmul.f32 %v137_v52, %v99_v51  ;;  %vm106_vm0 = vweird.f32 %v137_v52 }
  0xe7   :  { %vm107_vm2 = vmor %vm105_vm1, %vm106_vm0 }
  0xe8   :  { %v102_v54 = vsub.f32 1.0, %v101_v53 }
  0xea   :  { %v103_v56 = vmul.f32 %v137_v52, %v102_v54 }
  0xec   :  { %v104_v58 = vadd.f32 %v137_v52, %v103_v56 }
  0xee   :  { %v108_v60 = vsel %vm107_vm2, %v137_v52, %v104_v58 }
  0xef   :  { %v113_v61 = vsel %vm110_vm3, %v112_v59, %v108_v60 }
  0xf0   :  { %115 = vst [vmem:[#allocation3] sm:$0x1] %v113_v61 }
  0xf1   :  { %126 = dma.vmem_to_hbm [thread:$0]  %s122_s20, 16, %s124_s2, [#allocation4]  }
  0xf2   :  { %162 = dma.done.wait [#allocation4], 16  }
  0xf3   :  { %163 = vsyncadd [#allocation4], 4294967280 }
  0xf4   :  { %131 = vsyncpa [#allocation4], 1 }

// kernel: tpu_custom_call.1
= control target key start
LH: loop header
LB: loop body
LE: loop exit
PB: predicated region body
PF: predicated region fallthrough
CT: control target
= control target key end

     0   :  { %vm52_vm0 = vcmask 261120   ;;  %vm422_vm1 = vcmask 7168   ;;  %s872_s0 = inlined_call_operand.vmem [shape: f32[128,32], index: 0, kind: input, shape index: {}]   ;;  %s873_s1 = inlined_call_operand.vmem [shape: f32[1,32], index: 1, kind: input, shape index: {}]   ;;  %s874_s2 = inlined_call_operand.<no memory space> [shape: f32[1,1], index: 2, kind: input, shape index: {}]   ;;  %s875_s3 = inlined_call_operand.vmem [shape: f32[128,1], index: 3, kind: output, shape index: {}]  }
   0x1   :  { %v21_v0 = vld [vmem:[%s872_s0 + $0x20] sm:$0xff]  ;;  %v19_v2 = vld [vmem:[%s872_s0 + $0x10] sm:$0xff]  ;;  %v22_v7 = vld [vmem:[%s872_s0 + $0x28] sm:$0xff]  ;;  %v598_v49 = vstv %s874_s2 }
   0x2   :  { %v443_v1 = vld [vmem:[%s873_s1] ss:$0 sm:$0xff]  ;;  %v20_v8 = vld [vmem:[%s872_s0 + $0x18] sm:$0xff]  ;;  %v18_v12 = vld [vmem:[%s872_s0 + $0x8] sm:$0xff] }
   0x3   :  { %v17_v3 = vld [vmem:[%s872_s0] sm:$0xff]  ;;  %v40_v4 = vmul.f32 %v443_v1, %v21_v0  ;;  %v38_v5 = vmul.f32 %v443_v1, %v19_v2  ;;  %v41_v13 = vmul.f32 %v443_v1, %v22_v7  ;;  %v39_v14 = vmul.f32 %v443_v1, %v20_v8  ;;  %v24_v20 = vld [vmem:[%s872_s0 + $0x38] sm:$0xff]  ;;  %v23_v21 = vld [vmem:[%s872_s0 + $0x30] sm:$0xff] }
   0x4   :  { %v36_v6 = vmul.f32 %v443_v1, %v17_v3  ;;  %v37_v15 = vmul.f32 %v443_v1, %v18_v12  ;;  %v25_v19 = vld [vmem:[%s872_s0 + $0x40] sm:$0xff]  ;;  %v43_v23 = vmul.f32 %v443_v1, %v24_v20  ;;  %v42_v24 = vmul.f32 %v443_v1, %v23_v21  ;;  %v28_v28 = vld [vmem:[%s872_s0 + $0x58] sm:$0xff]  ;;  %v27_v29 = vld [vmem:[%s872_s0 + $0x50] sm:$0xff] }
   0x5   :  { %v65_v9 = vsel %vm52_vm0, %v40_v4, 0.0  ;;  %v59_v10 = vsel %vm52_vm0, %v38_v5, 0.0  ;;  %v68_v16 = vsel %vm52_vm0, %v41_v13, 0.0  ;;  %v62_v17 = vsel %vm52_vm0, %v39_v14, 0.0  ;;  %v26_v30 = vld [vmem:[%s872_s0 + $0x48] sm:$0xff]  ;;  %v31_v37 = vld [vmem:[%s872_s0 + $0x70] sm:$0xff] }
   0x6   :  { %v53_v11 = vsel %vm52_vm0, %v36_v6, 0.0  ;;  %66 = vadd.xlane.f32.xlu2 %v65_v9  ;;  %60 = vadd.xlane.f32.xlu1 %v59_v10  ;;  %v56_v18 = vsel %vm52_vm0, %v37_v15, 0.0  ;;  %v44_v22 = vmul.f32 %v443_v1, %v25_v19  ;;  %v74_v26 = vsel %vm52_vm0, %v43_v23, 0.0  ;;  %v30_v38 = vld [vmem:[%s872_s0 + $0x68] sm:$0xff]  ;;  %v29_v39 = vld [vmem:[%s872_s0 + $0x60] sm:$0xff]  ;;  %v32_v46 = vld [vmem:[%s872_s0 + $0x78] sm:$0xff] }
   0x7   :  { %54 = vadd.xlane.f32.xlu0 %v53_v11  ;;  %v71_v27 = vsel %vm52_vm0, %v42_v24, 0.0  ;;  %v47_v31 = vmul.f32 %v443_v1, %v28_v28  ;;  %v46_v32 = vmul.f32 %v443_v1, %v27_v29  ;;  %v45_v33 = vmul.f32 %v443_v1, %v26_v30 }
   0x8   :  { %v77_v25 = vsel %vm52_vm0, %v44_v22, 0.0  ;;  %v50_v40 = vmul.f32 %v443_v1, %v31_v37  ;;  %v49_v41 = vmul.f32 %v443_v1, %v30_v38  ;;  %v48_v42 = vmul.f32 %v443_v1, %v29_v39 }
   0x9   :  { %v86_v34 = vsel %vm52_vm0, %v47_v31, 0.0  ;;  %v83_v35 = vsel %vm52_vm0, %v46_v32, 0.0  ;;  %v80_v36 = vsel %vm52_vm0, %v45_v33, 0.0  ;;  %v51_v47 = vmul.f32 %v443_v1, %v32_v46 }
   0xa   :  { %v95_v43 = vsel %vm52_vm0, %v50_v40, 0.0  ;;  %v92_v44 = vsel %vm52_vm0, %v49_v41, 0.0  ;;  %v89_v45 = vsel %vm52_vm0, %v48_v42, 0.0 }
   0xb   :  { %v98_v48 = vsel %vm52_vm0, %v51_v47, 0.0 }
   0xe   :  { %69 = vadd.xlane.f32.xlu2 %v68_v16  ;;  %63 = vadd.xlane.f32.xlu1 %v62_v17 }
   0xf   :  { %57 = vadd.xlane.f32.xlu0 %v56_v18 }
  0x16   :  { %78 = vadd.xlane.f32.xlu2 %v77_v25  ;;  %75 = vadd.xlane.f32.xlu1 %v74_v26 }
  0x17   :  { %72 = vadd.xlane.f32.xlu0 %v71_v27 }
  0x1e   :  { %87 = vadd.xlane.f32.xlu2 %v86_v34  ;;  %84 = vadd.xlane.f32.xlu1 %v83_v35 }
  0x1f   :  { %81 = vadd.xlane.f32.xlu0 %v80_v36 }
  0x26   :  { %96 = vadd.xlane.f32.xlu2 %v95_v43  ;;  %93 = vadd.xlane.f32.xlu1 %v92_v44 }
  0x27   :  { %90 = vadd.xlane.f32.xlu0 %v89_v45 }
  0x2f   :  { %99 = vadd.xlane.f32.xlu0 %v98_v48 }
  0x79   :  { %v67_v50 = vpop.xlane.xlu2 %66  ;;  %v61_v51 = vpop.xlane.xlu1 %60 }
  0x7a   :  { %v106_v52 = vadd.f32 %v598_v49, %v67_v50  ;;  %v104_v53 = vadd.f32 %v598_v49, %v61_v51  ;;  %v55_v54 = vpop.xlane.xlu0 %54 }
  0x7b   :  { %v102_v55 = vadd.f32 %v598_v49, %v55_v54 }
  0x7c   :  { %v122_v56 = vsub.f32 0.0, %v106_v52  ;;  %v120_v57 = vsub.f32 0.0, %v104_v53 }
  0x7d   :  { %v118_v58 = vsub.f32 0.0, %v102_v55 }
  0x7e   :  { %v142_v59 = vmul.f32 1.442695, %v122_v56  ;;  %v138_v60 = vmul.f32 1.442695, %v120_v57 }
  0x7f   :  { %v134_v61 = vmul.f32 1.442695, %v118_v58 }
  0x80   :  { %444 = vpow2.f32 %v142_v59 }
  0x81   :  { %446 = vpow2.f32 %v138_v60  ;;  %v70_v62 = vpop.xlane.xlu2 %69  ;;  %v64_v63 = vpop.xlane.xlu1 %63 }
  0x82   :  { %448 = vpow2.f32 %v134_v61  ;;  %v107_v0 = vadd.f32 %v598_v49, %v70_v62  ;;  %v105_v1 = vadd.f32 %v598_v49, %v64_v63  ;;  %v58_v2 = vpop.xlane.xlu0 %57 }
  0x83   :  { %v103_v3 = vadd.f32 %v598_v49, %v58_v2 }
  0x84   :  { %v123_v4 = vsub.f32 0.0, %v107_v0  ;;  %v121_v5 = vsub.f32 0.0, %v105_v1 }
  0x85   :  { %v119_v6 = vsub.f32 0.0, %v103_v3 }
  0x86   :  { %v445_v7 = vpop.eup %444  ;;  %v144_v8 = vmul.f32 1.442695, %v123_v4  ;;  %v140_v11 = vmul.f32 1.442695, %v121_v5 }
  0x87   :  { %v447_v9 = vpop.eup %446  ;;  %v606_v10 = vadd.f32 1.0, %v445_v7  ;;  %v136_v14 = vmul.f32 1.442695, %v119_v6 }
  0x88   :  { %v449_v12 = vpop.eup %448  ;;  %v608_v13 = vadd.f32 1.0, %v447_v9  ;;  %450 = vpow2.f32 %v144_v8 }
  0x89   :  { %452 = vrcp.f32 %v606_v10  ;;  %v79_v15 = vpop.xlane.xlu2 %78  ;;  %v612_v16 = vadd.f32 1.0, %v449_v12  ;;  %v251_v17 = vand.u32 2147483647, %v606_v10  ;;  %v253_v18 = vand.u32 2147483648, %v606_v10  ;;  %v76_v20 = vpop.xlane.xlu1 %75 }
  0x8a   :  { %454 = vrcp.f32 %v608_v13  ;;  %v110_v19 = vadd.f32 %v598_v49, %v79_v15  ;;  %v221_v21 = vand.u32 2147483647, %v608_v13  ;;  %v223_v22 = vand.u32 2147483648, %v608_v13  ;;  %v73_v28 = vpop.xlane.xlu0 %72 }
  0x8b   :  { %456 = vpow2.f32 %v140_v11  ;;  %vm247_vm2 = vweird.f32 %v606_v10  ;;  %vm217_vm3 = vweird.f32 %v608_v13  ;;  %v109_v27 = vadd.f32 %v598_v49, %v76_v20 }
  0x8c   :  { %458 = vpow2.f32 %v136_v14  ;;  %v126_v24 = vsub.f32 0.0, %v110_v19  ;;  %vm626_vm4 = vcmp.eq.f32.partialorder %v251_v17, 8.507059e+37  ;;  %v254_v32 = vor.u32 1.1754944e-38, %v253_v18 }
  0x8d   :  { %460 = vrcp.f32 %v612_v16  ;;  %v191_v33 = vand.u32 2147483647, %v612_v16  ;;  %vm632_vm5 = vcmp.eq.f32.partialorder %v221_v21, 8.507059e+37  ;;  %v224_v38 = vor.u32 1.1754944e-38, %v223_v22 }
  0x8e   :  { %v451_v23 = vpop.eup %450  ;;  %v150_v34 = vmul.f32 1.442695, %v126_v24  ;;  %vm187_vm6 = vweird.f32 %v612_v16  ;;  %v193_v41 = vand.u32 2147483648, %v612_v16  ;;  %v642_v43 = vadd.f32 %v598_v49, %v73_v28 }
  0x8f   :  { %v453_v25 = vpop.eup %452  ;;  %v622_v26 = vadd.f32 1.0, %v451_v23  ;;  %v125_v47 = vsub.f32 0.0, %v109_v27  ;;  %vm647_vm8 = vcmp.eq.f32.partialorder %v191_v33, 8.507059e+37 }
  0x90   :  { %v455_v29 = vpop.eup %454  ;;  %v243_v30 = vmul.f32 %v453_v25, %v606_v10  ;;  %vm248_vm7 = vweird.f32 %v453_v25  ;;  %v194_v57 = vor.u32 1.1754944e-38, %v193_v41  ;;  %v124_v14 = vsub.f32 0.0, %v642_v43 }
  0x91   :  { %v457_v35 = vpop.eup %456  ;;  %v213_v36 = vmul.f32 %v455_v29, %v608_v13  ;;  %462 = vrcp.f32 %v622_v26  ;;  %v266_v52 = vand.u32 2147483647, %v622_v26  ;;  %vm218_vm9 = vweird.f32 %v455_v29  ;;  %vm249_vm11 = vmor %vm247_vm2, %vm248_vm7  ;;  %v88_v1 = vpop.xlane.xlu2 %87 }
  0x92   :  { %v459_v39 = vpop.eup %458  ;;  %v244_v40 = vsub.f32 1.0, %v243_v30  ;;  %v639_v42 = vadd.f32 1.0, %v457_v35  ;;  %464 = vpow2.f32 %v150_v34  ;;  %v268_v54 = vand.u32 2147483648, %v622_v26  ;;  %vm219_vm13 = vmor %vm217_vm3, %vm218_vm9  ;;  %v85_v2 = vpop.xlane.xlu1 %84 }
  0x93   :  { %v461_v44 = vpop.eup %460  ;;  %v214_v45 = vsub.f32 1.0, %v213_v36  ;;  %v644_v46 = vadd.f32 1.0, %v459_v39  ;;  %vm262_vm10 = vweird.f32 %v622_v26  ;;  %v148_v60 = vmul.f32 1.442695, %v125_v47  ;;  %v82_v21 = vpop.xlane.xlu0 %81 }
  0x94   :  { %v245_v48 = vmul.f32 %v453_v25, %v244_v40  ;;  %v183_v50 = vmul.f32 %v461_v44, %v612_v16  ;;  %466 = vrcp.f32 %v639_v42  ;;  %vm188_vm12 = vweird.f32 %v461_v44 }
  0x95   :  { %v215_v53 = vmul.f32 %v455_v29, %v214_v45  ;;  %468 = vrcp.f32 %v644_v46  ;;  %vm662_vm14 = vcmp.eq.f32.partialorder %v266_v52, 8.507059e+37  ;;  %v269_v6 = vor.u32 1.1754944e-38, %v268_v54  ;;  %vm189_vm0 = vmor %vm187_vm6, %vm188_vm12 }
  0x96   :  { %v246_v55 = vadd.f32 %v453_v25, %v245_v48  ;;  %v184_v56 = vsub.f32 1.0, %v183_v50  ;;  %vm232_vm15 = vweird.f32 %v639_v42  ;;  %v236_v10 = vand.u32 2147483647, %v639_v42 }
  0x97   :  { %v463_v58 = vpop.eup %462  ;;  %v216_v59 = vadd.f32 %v455_v29, %v215_v53  ;;  %v238_v12 = vand.u32 2147483648, %v639_v42  ;;  %470 = vpow2.f32 %v148_v60  ;;  %vm202_vm3 = vweird.f32 %v644_v46 }
  0x98   :  { %v250_v61 = vsel %vm249_vm11, %v453_v25, %v246_v55  ;;  %v185_v62 = vmul.f32 %v461_v44, %v184_v56  ;;  %v258_v63 = vmul.f32 %v463_v58, %v622_v26  ;;  %v465_v3 = vpop.eup %464  ;;  %vm263_vm2 = vweird.f32 %v463_v58 }
  0x99   :  { %v255_v4 = vsel %vm626_vm4, %v254_v32, %v250_v61  ;;  %v220_v5 = vsel %vm219_vm13, %v455_v29, %v216_v59  ;;  %v684_v13 = vadd.f32 1.0, %v465_v3  ;;  %v206_v16 = vand.u32 2147483647, %v644_v46  ;;  %v97_v40 = vpop.xlane.xlu2 %96 }
  0x9a   :  { %427 = vst.msk [vmem:[%s875_s3 + $0x20] sm:$0xff] %vm422_vm1, %v255_v4  ;;  %v225_v7 = vsel %vm632_vm5, %v224_v38, %v220_v5  ;;  %v186_v8 = vadd.f32 %v461_v44, %v185_v62  ;;  %v259_v9 = vsub.f32 1.0, %v258_v63  ;;  %v467_v11 = vpop.eup %466  ;;  %vm697_vm4 = vcmp.eq.f32.partialorder %v236_v10, 8.507059e+37  ;;  %vm264_vm5 = vmor %vm262_vm10, %vm263_vm2  ;;  %v94_v41 = vpop.xlane.xlu1 %93 }
  0x9b   :  { %425 = vst.msk [vmem:[%s875_s3 + $0x10] sm:$0xff] %vm422_vm1, %v225_v7  ;;  %v228_v18 = vmul.f32 %v467_v11, %v639_v42  ;;  %v469_v19 = vpop.eup %468  ;;  %472 = vrcp.f32 %v684_v13  ;;  %vm233_vm6 = vweird.f32 %v467_v11  ;;  %v208_v27 = vand.u32 2147483648, %v644_v46  ;;  %v91_v63 = vpop.xlane.xlu0 %90 }
  0x9c   :  { %v190_v15 = vsel %vm189_vm0, %v461_v44, %v186_v8  ;;  %v260_v17 = vmul.f32 %v463_v58, %v259_v9  ;;  %v198_v25 = vmul.f32 %v469_v19, %v644_v46  ;;  %v146_v28 = vmul.f32 1.442695, %v124_v14 }
  0x9d   :  { %v195_v20 = vsel %vm647_vm8, %v194_v57, %v190_v15  ;;  %v229_v23 = vsub.f32 1.0, %v228_v18  ;;  %v113_v29 = vadd.f32 %v598_v49, %v88_v1  ;;  %v112_v33 = vadd.f32 %v598_v49, %v85_v2  ;;  %v471_v34 = vpop.eup %470  ;;  %vm234_vm8 = vmor %vm232_vm15, %vm233_vm6 }
  0x9e   :  { %423 = vst.msk [vmem:[%s875_s3] sm:$0xff] %vm422_vm1, %v195_v20  ;;  %v261_v22 = vadd.f32 %v463_v58, %v260_v17  ;;  %v199_v32 = vsub.f32 1.0, %v198_v25  ;;  %v239_v36 = vor.u32 1.1754944e-38, %v238_v12  ;;  %vm203_vm7 = vweird.f32 %v469_v19 }
  0x9f   :  { %v230_v31 = vmul.f32 %v467_v11, %v229_v23  ;;  %474 = vpow2.f32 %v146_v28  ;;  %v713_v38 = vadd.f32 1.0, %v471_v34  ;;  %v129_v39 = vsub.f32 0.0, %v113_v29  ;;  %vm204_vm11 = vmor %vm202_vm3, %vm203_vm7 }
  0xa0   :  { %v265_v30 = vsel %vm264_vm5, %v463_v58, %v261_v22  ;;  %v200_v37 = vmul.f32 %v469_v19, %v199_v32  ;;  %vm718_vm9 = vcmp.eq.f32.partialorder %v206_v16, 8.507059e+37  ;;  %v209_v45 = vor.u32 1.1754944e-38, %v208_v27 }
  0xa1   :  { %v270_v35 = vsel %vm662_vm14, %v269_v6, %v265_v30  ;;  %v231_v26 = vadd.f32 %v467_v11, %v230_v31  ;;  %v473_v43 = vpop.eup %472  ;;  %v128_v47 = vsub.f32 0.0, %v112_v33  ;;  %v111_v48 = vadd.f32 %v598_v49, %v82_v21 }
  0xa2   :  { %428 = vst.msk [vmem:[%s875_s3 + $0x28] sm:$0xff] %vm422_vm1, %v270_v35  ;;  %v201_v51 = vadd.f32 %v469_v19, %v200_v37  ;;  %v303_v52 = vmul.f32 %v473_v43, %v684_v13  ;;  %vm307_vm10 = vweird.f32 %v684_v13  ;;  %476 = vrcp.f32 %v713_v38 }
  0xa3   :  { %v235_v50 = vsel %vm234_vm8, %v467_v11, %v231_v26  ;;  %v116_v42 = vadd.f32 %v598_v49, %v97_v40  ;;  %v115_v54 = vadd.f32 %v598_v49, %v94_v41  ;;  %v311_v57 = vand.u32 2147483647, %v684_v13  ;;  %v100_v25 = vpop.xlane.xlu0 %99 }
  0xa4   :  { %v240_v53 = vsel %vm697_vm4, %v239_v36, %v235_v50  ;;  %v205_v55 = vsel %vm204_vm11, %v469_v19, %v201_v51  ;;  %v304_v56 = vsub.f32 1.0, %v303_v52  ;;  %v156_v58 = vmul.f32 1.442695, %v129_v39 }
  0xa5   :  { %426 = vst.msk [vmem:[%s875_s3 + $0x18] sm:$0xff] %vm422_vm1, %v240_v53  ;;  %v475_v59 = vpop.eup %474  ;;  %v210_v46 = vsel %vm718_vm9, %v209_v45, %v205_v55  ;;  %v313_v60 = vand.u32 2147483648, %v684_v13  ;;  %v154_v61 = vmul.f32 1.442695, %v128_v47  ;;  %v127_v62 = vsub.f32 0.0, %v111_v48 }
  0xa6   :  { %424 = vst.msk [vmem:[%s875_s3 + $0x8] sm:$0xff] %vm422_vm1, %v210_v46  ;;  %v305_v0 = vmul.f32 %v473_v43, %v304_v56  ;;  %vm308_vm12 = vweird.f32 %v473_v43  ;;  %v745_v1 = vadd.f32 1.0, %v475_v59  ;;  %478 = vpow2.f32 %v156_v58 }
  0xa7   :  { %480 = vpow2.f32 %v154_v61  ;;  %v152_v2 = vmul.f32 1.442695, %v127_v62  ;;  %v132_v3 = vsub.f32 0.0, %v116_v42  ;;  %v131_v4 = vsub.f32 0.0, %v115_v54  ;;  %vm309_vm13 = vmor %vm307_vm10, %vm308_vm12 }
  0xa8   :  { %v306_v5 = vadd.f32 %v473_v43, %v305_v0  ;;  %482 = vrcp.f32 %v745_v1  ;;  %v477_v6 = vpop.eup %476  ;;  %v314_v7 = vor.u32 1.1754944e-38, %v313_v60  ;;  %vm312_vm14 = vcmp.eq.f32.partialorder %v311_v57, 8.507059e+37 }
  0xa9   :  { %484 = vpow2.f32 %v152_v2  ;;  %v162_v8 = vmul.f32 1.442695, %v132_v3  ;;  %v160_v9 = vmul.f32 1.442695, %v131_v4  ;;  %v288_v11 = vmul.f32 %v477_v6, %v713_v38 }
  0xaa   :  { %v310_v10 = vsel %vm309_vm13, %v473_v43, %v306_v5  ;;  %vm292_vm15 = vweird.f32 %v713_v38  ;;  %v298_v17 = vand.u32 2147483648, %v713_v38  ;;  %vm293_vm0 = vweird.f32 %v477_v6 }
  0xab   :  { %v315_v12 = vsel %vm312_vm14, %v314_v7, %v310_v10  ;;  %486 = vpow2.f32 %v162_v8  ;;  %v289_v15 = vsub.f32 1.0, %v288_v11  ;;  %v296_v16 = vand.u32 2147483647, %v713_v38  ;;  %vm294_vm2 = vmor %vm292_vm15, %vm293_vm0 }
  0xac   :  { %v479_v14 = vpop.eup %478  ;;  %431 = vst.msk [vmem:[%s875_s3 + $0x40] sm:$0xff] %vm422_vm1, %v315_v12  ;;  %488 = vpow2.f32 %v160_v9  ;;  %v281_v24 = vand.u32 2147483647, %v745_v1  ;;  %v283_v28 = vand.u32 2147483648, %v745_v1  ;;  %v114_v29 = vadd.f32 %v598_v49, %v91_v63 }
  0xad   :  { %v481_v13 = vpop.eup %480  ;;  %v757_v18 = vadd.f32 1.0, %v479_v14  ;;  %v290_v20 = vmul.f32 %v477_v6, %v289_v15  ;;  %v299_v31 = vor.u32 1.1754944e-38, %v298_v17  ;;  %vm297_vm3 = vcmp.eq.f32.partialorder %v296_v16, 8.507059e+37 }
  0xae   :  { %v483_v19 = vpop.eup %482  ;;  %v760_v21 = vadd.f32 1.0, %v481_v13  ;;  %v117_v36 = vadd.f32 %v598_v49, %v100_v25  ;;  %vm277_vm4 = vweird.f32 %v745_v1  ;;  %vm778_vm6 = vcmp.eq.f32.partialorder %v281_v24, 8.507059e+37 }
  0xaf   :  { %v485_v22 = vpop.eup %484  ;;  %v273_v23 = vmul.f32 %v483_v19, %v745_v1  ;;  %490 = vrcp.f32 %v757_v18  ;;  %v291_v27 = vadd.f32 %v477_v6, %v290_v20  ;;  %vm278_vm5 = vweird.f32 %v483_v19 }
  0xb0   :  { %492 = vrcp.f32 %v760_v21  ;;  %v770_v35 = vadd.f32 1.0, %v485_v22  ;;  %v284_v39 = vor.u32 1.1754944e-38, %v283_v28  ;;  %v130_v40 = vsub.f32 0.0, %v114_v29  ;;  %vm279_vm7 = vmor %vm277_vm4, %vm278_vm5 }
  0xb1   :  { %v487_v30 = vpop.eup %486  ;;  %v274_v32 = vsub.f32 1.0, %v273_v23  ;;  %v295_v34 = vsel %vm294_vm2, %v477_v6, %v291_v27  ;;  %v356_v43 = vand.u32 2147483647, %v757_v18  ;;  %vm352_vm8 = vweird.f32 %v757_v18 }
  0xb2   :  { %v489_v33 = vpop.eup %488  ;;  %v300_v26 = vsel %vm297_vm3, %v299_v31, %v295_v34  ;;  %494 = vrcp.f32 %v770_v35  ;;  %v784_v44 = vadd.f32 1.0, %v487_v30  ;;  %v358_v50 = vand.u32 2147483648, %v757_v18 }
  0xb3   :  { %v275_v37 = vmul.f32 %v483_v19, %v274_v32  ;;  %430 = vst.msk [vmem:[%s875_s3 + $0x38] sm:$0xff] %vm422_vm1, %v300_v26  ;;  %v786_v45 = vadd.f32 1.0, %v489_v33  ;;  %v133_v51 = vsub.f32 0.0, %v117_v36  ;;  %v341_v42 = vand.u32 2147483647, %v760_v21 }
  0xb4   :  { %496 = vrcp.f32 %v784_v44  ;;  %v343_v56 = vand.u32 2147483648, %v760_v21  ;;  %v158_v57 = vmul.f32 1.442695, %v130_v40  ;;  %vm801_vm9 = vcmp.eq.f32.partialorder %v356_v43, 8.507059e+37 }
  0xb5   :  { %v491_v41 = vpop.eup %490  ;;  %v276_v49 = vadd.f32 %v483_v19, %v275_v37  ;;  %vm337_vm10 = vweird.f32 %v760_v21  ;;  %498 = vrcp.f32 %v786_v45  ;;  %v359_v61 = vor.u32 1.1754944e-38, %v358_v50 }
  0xb6   :  { %v493_v47 = vpop.eup %492  ;;  %v348_v48 = vmul.f32 %v491_v41, %v757_v18  ;;  %vm353_vm11 = vweird.f32 %v491_v41  ;;  %v326_v62 = vand.u32 2147483647, %v770_v35  ;;  %vm808_vm13 = vcmp.eq.f32.partialorder %v341_v42, 8.507059e+37 }
  0xb7   :  { %v280_v52 = vsel %vm279_vm7, %v483_v19, %v276_v49  ;;  %v333_v53 = vmul.f32 %v493_v47, %v760_v21  ;;  %vm338_vm12 = vweird.f32 %v493_v47  ;;  %v344_v3 = vor.u32 1.1754944e-38, %v343_v56  ;;  %vm354_vm14 = vmor %vm352_vm8, %vm353_vm11 }
  0xb8   :  { %v285_v54 = vsel %vm778_vm6, %v284_v39, %v280_v52  ;;  %v349_v55 = vsub.f32 1.0, %v348_v48  ;;  %v495_v46 = vpop.eup %494  ;;  %v328_v4 = vand.u32 2147483648, %v770_v35  ;;  %500 = vpow2.f32 %v158_v57  ;;  %vm339_vm0 = vmor %vm337_vm10, %vm338_vm12 }
  0xb9   :  { %429 = vst.msk [vmem:[%s875_s3 + $0x30] sm:$0xff] %vm422_vm1, %v285_v54  ;;  %v334_v59 = vsub.f32 1.0, %v333_v53  ;;  %v318_v1 = vmul.f32 %v495_v46, %v770_v35  ;;  %vm322_vm15 = vweird.f32 %v770_v35  ;;  %v164_v8 = vmul.f32 1.442695, %v133_v51 }
  0xba   :  { %v350_v60 = vmul.f32 %v491_v41, %v349_v55  ;;  %v497_v5 = vpop.eup %496  ;;  %vm323_vm2 = vweird.f32 %v495_v46  ;;  %vm819_vm3 = vcmp.eq.f32.partialorder %v326_v62, 8.507059e+37  ;;  %v329_v18 = vor.u32 1.1754944e-38, %v328_v4 }
  0xbb   :  { %v335_v63 = vmul.f32 %v493_v47, %v334_v59  ;;  %v319_v7 = vsub.f32 1.0, %v318_v1  ;;  %v393_v11 = vmul.f32 %v497_v5, %v784_v44  ;;  %v499_v12 = vpop.eup %498  ;;  %502 = vpow2.f32 %v164_v8  ;;  %vm324_vm5 = vmor %vm322_vm15, %vm323_vm2 }
  0xbc   :  { %v351_v2 = vadd.f32 %v491_v41, %v350_v60  ;;  %v378_v20 = vmul.f32 %v499_v12, %v786_v45  ;;  %vm397_vm4 = vweird.f32 %v784_v44  ;;  %v401_v21 = vand.u32 2147483647, %v784_v44 }
  0xbd   :  { %v336_v6 = vadd.f32 %v493_v47, %v335_v63  ;;  %v320_v13 = vmul.f32 %v495_v46, %v319_v7  ;;  %v394_v19 = vsub.f32 1.0, %v393_v11  ;;  %v403_v22 = vand.u32 2147483648, %v784_v44 }
  0xbe   :  { %v355_v9 = vsel %vm354_vm14, %v491_v41, %v351_v2  ;;  %v501_v23 = vpop.eup %500  ;;  %vm398_vm6 = vweird.f32 %v497_v5  ;;  %v379_v25 = vsub.f32 1.0, %v378_v20  ;;  %vm382_vm7 = vweird.f32 %v786_v45 }
  0xbf   :  { %v360_v14 = vsel %vm801_vm9, %v359_v61, %v355_v9  ;;  %v340_v15 = vsel %vm339_vm0, %v493_v47, %v336_v6  ;;  %v321_v16 = vadd.f32 %v495_v46, %v320_v13  ;;  %v395_v24 = vmul.f32 %v497_v5, %v394_v19  ;;  %vm399_vm9 = vmor %vm397_vm4, %vm398_vm6 }
  0xc0   :  { %434 = vst.msk [vmem:[%s875_s3 + $0x58] sm:$0xff] %vm422_vm1, %v360_v14  ;;  %v345_v17 = vsel %vm808_vm13, %v344_v3, %v340_v15  ;;  %v386_v28 = vand.u32 2147483647, %v786_v45  ;;  %v388_v29 = vand.u32 2147483648, %v786_v45  ;;  %v178_v30 = vadd.f32 1.0, %v501_v23 }
  0xc1   :  { %433 = vst.msk [vmem:[%s875_s3 + $0x50] sm:$0xff] %vm422_vm1, %v345_v17  ;;  %v325_v27 = vsel %vm324_vm5, %v495_v46, %v321_v16  ;;  %v396_v32 = vadd.f32 %v497_v5, %v395_v24  ;;  %v380_v33 = vmul.f32 %v499_v12, %v379_v25  ;;  %vm383_vm8 = vweird.f32 %v499_v12  ;;  %v503_v34 = vpop.eup %502 }
  0xc2   :  { %v330_v31 = vsel %vm819_vm3, %v329_v18, %v325_v27  ;;  %v404_v35 = vor.u32 1.1754944e-38, %v403_v22  ;;  %504 = vrcp.f32 %v178_v30  ;;  %vm402_vm10 = vcmp.eq.f32.partialorder %v401_v21, 8.507059e+37  ;;  %vm384_vm11 = vmor %vm382_vm7, %vm383_vm8 }
  0xc3   :  { %432 = vst.msk [vmem:[%s875_s3 + $0x48] sm:$0xff] %vm422_vm1, %v330_v31  ;;  %v400_v36 = vsel %vm399_vm9, %v497_v5, %v396_v32  ;;  %v381_v26 = vadd.f32 %v499_v12, %v380_v33  ;;  %v181_v37 = vadd.f32 1.0, %v503_v34  ;;  %v389_v39 = vor.u32 1.1754944e-38, %v388_v29 }
  0xc4   :  { %v405_v38 = vsel %vm402_vm10, %v404_v35, %v400_v36  ;;  %vm387_vm12 = vcmp.eq.f32.partialorder %v386_v28, 8.507059e+37  ;;  %v373_v47 = vand.u32 2147483648, %v178_v30  ;;  %v371_v51 = vand.u32 2147483647, %v178_v30 }
  0xc5   :  { %437 = vst.msk [vmem:[%s875_s3 + $0x70] sm:$0xff] %vm422_vm1, %v405_v38  ;;  %v385_v40 = vsel %vm384_vm11, %v499_v12, %v381_v26  ;;  %506 = vrcp.f32 %v181_v37  ;;  %vm367_vm14 = vweird.f32 %v178_v30  ;;  %v418_v42 = vand.u32 2147483648, %v181_v37 }
  0xc6   :  { %v390_v41 = vsel %vm387_vm12, %v389_v39, %v385_v40  ;;  %v374_v54 = vor.u32 1.1754944e-38, %v373_v47  ;;  %v416_v56 = vand.u32 2147483647, %v181_v37  ;;  %vm372_vm2 = vcmp.eq.f32.partialorder %v371_v51, 8.507059e+37 }
  0xc7   :  { %436 = vst.msk [vmem:[%s875_s3 + $0x68] sm:$0xff] %vm422_vm1, %v390_v41  ;;  %vm412_vm3 = vweird.f32 %v181_v37  ;;  %v419_v46 = vor.u32 1.1754944e-38, %v418_v42 }
  0xc8   :  { %v505_v49 = vpop.eup %504  ;;  %vm417_vm5 = vcmp.eq.f32.partialorder %v416_v56, 8.507059e+37 }
  0xc9   :  { %v363_v43 = vmul.f32 %v505_v49, %v178_v30  ;;  %vm368_vm13 = vweird.f32 %v505_v49 }
  0xca   :  { %vm369_vm15 = vmor %vm367_vm14, %vm368_vm13 }
  0xcb   :  { %v507_v44 = vpop.eup %506  ;;  %v364_v45 = vsub.f32 1.0, %v363_v43 }
  0xcc   :  { %v408_v48 = vmul.f32 %v507_v44, %v181_v37  ;;  %vm413_vm0 = vweird.f32 %v507_v44 }
  0xcd   :  { %v365_v50 = vmul.f32 %v505_v49, %v364_v45  ;;  %vm414_vm4 = vmor %vm412_vm3, %vm413_vm0 }
  0xce   :  { %v409_v52 = vsub.f32 1.0, %v408_v48 }
  0xcf   :  { %v366_v53 = vadd.f32 %v505_v49, %v365_v50 }
  0xd0   :  { %v410_v55 = vmul.f32 %v507_v44, %v409_v52 }
  0xd1   :  { %v370_v57 = vsel %vm369_vm15, %v505_v49, %v366_v53 }
  0xd2   :  { %v375_v58 = vsel %vm372_vm2, %v374_v54, %v370_v57  ;;  %v411_v59 = vadd.f32 %v507_v44, %v410_v55 }
  0xd3   :  { %435 = vst.msk [vmem:[%s875_s3 + $0x60] sm:$0xff] %vm422_vm1, %v375_v58 }
  0xd4   :  { %v415_v60 = vsel %vm414_vm4, %v507_v44, %v411_v59 }
  0xd5   :  { %v420_v61 = vsel %vm417_vm5, %v419_v46, %v415_v60 }
  0xd6   :  { %438 = vst.msk [vmem:[%s875_s3 + $0x78] sm:$0xff] %vm422_vm1, %v420_v61 }

</bundles_post_ra>
